<compile_context>
chip_gen: v7x
topology: tpu7x:2x2x1
jax: 0.10.0
libtpu: 0.0.40
codegen_flags: <defaults>
</compile_context>

<pallas_src>
import functools

import jax
import jax.numpy as jnp
import numpy as np
from jax.experimental import pallas as pl
from jax.experimental.pallas import tpu as pltpu


def fused_convnet_kernel(x_ref, w1_ref, b1_ref, w2_ref, b2_ref, w3_ref,
                         b3_ref, o_ref, *, taps):
    """One batch block: relu(conv3(relu(conv2(relu(conv1(x)))))).

    x_ref : (Nb, C0, L)        input block, native PyTorch NCL layout
    wi_ref: (Ki*Ci, Couti)     im2col weight matrix for layer i (bf16)
    bi_ref: (1, Couti)         bias for layer i (f32)
    o_ref : (Nb, L, 128)       output block, NLC layout (lane-dense store)
    """
    nb, c0, L = x_ref.shape

    # NCL -> NLC in-kernel: tiny (C0=6, L) slab per sample; XLU work that
    # overlaps MXU/VALU, and avoids a full-tensor HBM transpose in the wrapper.
    a = jnp.transpose(x_ref[...].astype(jnp.float32), (0, 2, 1))     # (Nb, L, C0)

    def conv_relu(a, w_ref, b_ref, K, P):
        # a: (Nb, L, Cin) -> (Nb, L, Cout); per-sample 'same' zero padding,
        # then ONE im2col matmul with M = Nb*L rows.
        nb_, L_, C = a.shape
        zp = jnp.zeros((nb_, P, C), jnp.float32)
        ap = jnp.concatenate([zp, a, zp], axis=1)                     # (Nb, L+K-1, C)
        cols = jnp.concatenate([ap[:, k:k + L_, :] for k in range(K)],
                               axis=2)                                # (Nb, L, K*C)
        cols = cols.reshape(nb_ * L_, K * C).astype(jnp.bfloat16)     # (Nb*L, K*C)
        y = jax.lax.dot_general(
            cols, w_ref[...],
            dimension_numbers=(((1,), (0,)), ((), ())),
            preferred_element_type=jnp.float32)                       # (Nb*L, Cout)
        y = jnp.maximum(y + b_ref[...], 0.0)                          # bias+ReLU in f32
        return y.reshape(nb_, L_, -1)

    (k1, p1), (k2, p2), (k3, p3) = taps
    a = conv_relu(a, w1_ref, b1_ref, k1, p1)
    a = conv_relu(a, w2_ref, b2_ref, k2, p2)
    a = conv_relu(a, w3_ref, b3_ref, k3, p3)
    o_ref[...] = a.astype(o_ref.dtype)


def init_params(key):
    """Deterministic parameters with PyTorch Conv1d shapes/init style."""
    layer_cfg = [  # (Cout, Cin, K, pad)
        (32, 6, 5, 2),
        (64, 32, 3, 1),
        (128, 64, 3, 1),
    ]
    params = []
    for (cout, cin, k, pad) in layer_cfg:
        key, kw, kb = jax.random.split(key, 3)
        bound = 1.0 / np.sqrt(cin * k)
        w = jax.random.uniform(kw, (cout, cin, k), jnp.float32, -bound, bound)
        b = jax.random.uniform(kb, (cout,), jnp.float32, -bound, bound)
        params.append((w, b, k, pad))
    return params


def pack_params(params):
    """Hoisted once: (Cout, Cin, K) -> im2col (K*Cin, Cout) bf16; bias -> (1, Cout) f32."""
    packed = []
    for (w, b, k, pad) in params:
        cout, cin, _ = w.shape
        # Wm[k*Cin + c, cout] = w[cout, c, k]   (matches k-major, Cin-minor cols)
        w_m = jnp.transpose(w, (2, 1, 0)).reshape(k * cin, cout).astype(jnp.bfloat16)
        packed.append((w_m, b.reshape(1, cout).astype(jnp.float32), k, pad))
    return packed


def _choose_nb(N, L, target_rows=512):
    """Samples per grid step: fold batch into M, keep >=2 steps for v7x's 2 TCs."""
    nb = max(1, min(N, max(1, target_rows // max(L, 1))))
    if N >= 2:
        nb = min(nb, N // 2)
    while N % nb != 0:
        nb -= 1
    return nb


@functools.partial(jax.jit, static_argnames=("taps",))
def _convnet_pallas(x_ncl, w1, b1, w2, b2, w3, b3, *, taps):
    N, C0, L = x_ncl.shape
    cout = w3.shape[-1]
    nb = _choose_nb(N, L)
    kernel = functools.partial(fused_convnet_kernel, taps=taps)
    return pl.pallas_call(
        kernel,
        out_shape=jax.ShapeDtypeStruct((N, L, cout), jnp.float32),
        grid_spec=pltpu.PrefetchScalarGridSpec(
            num_scalar_prefetch=0,
            grid=(N // nb,),
            in_specs=[
                pl.BlockSpec((nb, C0, L), lambda n: (n, 0, 0)),
                # Weights / biases: full-array blocks, resident across steps.
                pl.BlockSpec(w1.shape, lambda n: (0, 0)),
                pl.BlockSpec(b1.shape, lambda n: (0, 0)),
                pl.BlockSpec(w2.shape, lambda n: (0, 0)),
                pl.BlockSpec(b2.shape, lambda n: (0, 0)),
                pl.BlockSpec(w3.shape, lambda n: (0, 0)),
                pl.BlockSpec(b3.shape, lambda n: (0, 0)),
            ],
            out_specs=pl.BlockSpec((nb, L, cout), lambda n: (n, 0, 0)),
        ),
        compiler_params=pltpu.CompilerParams(
            dimension_semantics=("parallel",)),
    )(x_ncl, w1, b1, w2, b2, w3, b3)


def convnet_forward(x_ncl, packed):
    """ConvNet forward.  x_ncl: (N, 6, L) f32 -> (N, L, 128) f32 (NLC).

    NLC output keeps the HBM store lane-dense (L is generally not a multiple
    of 128); downstream consumers should fuse on the NLC layout.
    """
    (w1, b1, k1, p1), (w2, b2, k2, p2), (w3, b3, k3, p3) = packed
    taps = ((k1, p1), (k2, p2), (k3, p3))
    return _convnet_pallas(x_ncl, w1, b1, w2, b2, w3, b3, taps=taps)


def convnet_forward_ncl(x_ncl, packed):
    """PyTorch-convention wrapper: (N, 6, L) -> (N, 128, L).  The final
    transpose is an extra HBM pass; prefer convnet_forward (NLC) in pipelines."""
    return jnp.transpose(convnet_forward(x_ncl, packed), (0, 2, 1))


def convnet_reference(x_ncl, params):
    """Pure-JAX f32 reference (lax.conv) for correctness checking."""
    x = x_ncl
    for (w, b, k, pad) in params:
        y = jax.lax.conv_general_dilated(
            x, w, window_strides=(1,), padding=[(pad, pad)],
            dimension_numbers=("NCH", "OIH", "NCH"))
        x = jax.nn.relu(y + b[None, :, None])
    return x


if __name__ == "__main__":
    key = jax.random.PRNGKey(0)
    key, kx = jax.random.split(key)

    # batch=8, in_channels=6, seq_len=16  (Conv1d 6 -> 32 -> 64 -> 128 stack)
    N, C0, L = 8, 6, 16
    x = jax.random.normal(kx, (N, C0, L), jnp.float32)
    params = init_params(key)
    packed = pack_params(params)

    out_nlc = jax.block_until_ready(convnet_forward(x, packed))       # (N, L, 128)
    out_ncl = jax.block_until_ready(convnet_forward_ncl(x, packed))   # (N, 128, L)
    ref_ncl = jax.block_until_ready(convnet_reference(x, params))     # (N, 128, L)

    assert out_nlc.shape == (N, L, 128), out_nlc.shape
    assert out_ncl.shape == (N, 128, L), out_ncl.shape

    ref_nlc = np.transpose(np.asarray(ref_ncl), (0, 2, 1))
    # bf16 matmul operands (f32 accumulate) -> loosened tolerance vs. f32 ref.
    assert np.allclose(np.asarray(out_nlc), ref_nlc, atol=5e-2, rtol=5e-2)
    assert np.allclose(np.asarray(out_ncl), np.asarray(ref_ncl), atol=5e-2, rtol=5e-2)

    print("KERNEL_OK")
</pallas_src>

<mosaic_0001>
module attributes {stable_mosaic.version = 11 : i64} {
  func.func @fused_convnet_kernel(%arg0: i32, %arg1: memref<4x6x16xf32, #tpu.memory_space<vmem>>, %arg2: memref<30x32xbf16, #tpu.memory_space<vmem>>, %arg3: memref<1x32xf32, #tpu.memory_space<vmem>>, %arg4: memref<96x64xbf16, #tpu.memory_space<vmem>>, %arg5: memref<1x64xf32, #tpu.memory_space<vmem>>, %arg6: memref<192x128xbf16, #tpu.memory_space<vmem>>, %arg7: memref<1x128xf32, #tpu.memory_space<vmem>>, %arg8: memref<4x16x128xf32, #tpu.memory_space<vmem>>) attributes {dimension_semantics = [#tpu.dimension_semantics<parallel>], iteration_bounds = array<i64: 2>, scalar_prefetch = 0 : i64, scratch_operands = 0 : i64, tpu.core_type = #tpu.core_type<tc>, window_params = [{transform_indices = @transform_0, window_bounds = array<i64: 4, 6, 16>}, {pipeline_mode = #tpu.pipeline_mode<synchronous>, transform_indices = @transform_1, window_bounds = array<i64: 30, 32>}, {pipeline_mode = #tpu.pipeline_mode<synchronous>, transform_indices = @transform_2, window_bounds = array<i64: 1, 32>}, {pipeline_mode = #tpu.pipeline_mode<synchronous>, transform_indices = @transform_3, window_bounds = array<i64: 96, 64>}, {pipeline_mode = #tpu.pipeline_mode<synchronous>, transform_indices = @transform_4, window_bounds = array<i64: 1, 64>}, {pipeline_mode = #tpu.pipeline_mode<synchronous>, transform_indices = @transform_5, window_bounds = array<i64: 192, 128>}, {pipeline_mode = #tpu.pipeline_mode<synchronous>, transform_indices = @transform_6, window_bounds = array<i64: 1, 128>}, {transform_indices = @transform_7, window_bounds = array<i64: 4, 16, 128>}]} {
    %c0 = arith.constant 0 : index
    %c0_0 = arith.constant 0 : index
    %c0_1 = arith.constant 0 : index
    %0 = vector.load %arg1[%c0, %c0_0, %c0_1] : memref<4x6x16xf32, #tpu.memory_space<vmem>>, vector<4x6x16xf32>
    %1 = tpu.transpose %0, [0, 2, 1] : vector<4x6x16xf32> -> vector<4x16x6xf32>
    %cst = arith.constant 0.000000e+00 : f32
    %2 = vector.broadcast %cst : f32 to vector<4x2x6xf32>
    %3 = tpu.concatenate %2, %1, %2 in 1 : vector<4x2x6xf32>, vector<4x16x6xf32>, vector<4x2x6xf32> -> vector<4x20x6xf32>
    %4 = vector.extract_strided_slice %3 {offsets = [0, 0, 0], sizes = [4, 16, 6], strides = [1, 1, 1]} : vector<4x20x6xf32> to vector<4x16x6xf32>
    %5 = vector.extract_strided_slice %3 {offsets = [0, 1, 0], sizes = [4, 16, 6], strides = [1, 1, 1]} : vector<4x20x6xf32> to vector<4x16x6xf32>
    %6 = vector.extract_strided_slice %3 {offsets = [0, 2, 0], sizes = [4, 16, 6], strides = [1, 1, 1]} : vector<4x20x6xf32> to vector<4x16x6xf32>
    %7 = vector.extract_strided_slice %3 {offsets = [0, 3, 0], sizes = [4, 16, 6], strides = [1, 1, 1]} : vector<4x20x6xf32> to vector<4x16x6xf32>
    %8 = vector.extract_strided_slice %3 {offsets = [0, 4, 0], sizes = [4, 16, 6], strides = [1, 1, 1]} : vector<4x20x6xf32> to vector<4x16x6xf32>
    %9 = tpu.concatenate %4, %5, %6, %7, %8 in 2 : vector<4x16x6xf32>, vector<4x16x6xf32>, vector<4x16x6xf32>, vector<4x16x6xf32>, vector<4x16x6xf32> -> vector<4x16x30xf32>
    %10 = vector.shape_cast %9 : vector<4x16x30xf32> to vector<64x30xf32>
    %11 = arith.truncf %10 : vector<64x30xf32> to vector<64x30xbf16>
    %c0_2 = arith.constant 0 : index
    %c0_3 = arith.constant 0 : index
    %12 = vector.load %arg2[%c0_2, %c0_3] : memref<30x32xbf16, #tpu.memory_space<vmem>>, vector<30x32xbf16>
    %cst_4 = arith.constant dense<0.000000e+00> : vector<64x32xf32>
    %13 = tpu.matmul %11, %12, %cst_4 {dimension_numbers = #tpu.dot_dimension_numbers<[1], [0], [0], [1], [0, 0, 1, 1], [], []>} : vector<64x30xbf16>, vector<30x32xbf16>, vector<64x32xf32> -> vector<64x32xf32>
    %c0_5 = arith.constant 0 : index
    %c0_6 = arith.constant 0 : index
    %14 = vector.load %arg3[%c0_5, %c0_6] : memref<1x32xf32, #tpu.memory_space<vmem>>, vector<1x32xf32>
    %15 = vector.broadcast %14 : vector<1x32xf32> to vector<64x32xf32>
    %16 = arith.addf %13, %15 : vector<64x32xf32>
    %cst_7 = arith.constant 0.000000e+00 : f32
    %17 = vector.broadcast %cst_7 : f32 to vector<64x32xf32>
    %18 = arith.maximumf %16, %17 : vector<64x32xf32>
    %19 = vector.shape_cast %18 : vector<64x32xf32> to vector<4x16x32xf32>
    %cst_8 = arith.constant 0.000000e+00 : f32
    %20 = vector.broadcast %cst_8 : f32 to vector<4x1x32xf32>
    %21 = tpu.concatenate %20, %19, %20 in 1 : vector<4x1x32xf32>, vector<4x16x32xf32>, vector<4x1x32xf32> -> vector<4x18x32xf32>
    %22 = vector.extract_strided_slice %21 {offsets = [0, 0, 0], sizes = [4, 16, 32], strides = [1, 1, 1]} : vector<4x18x32xf32> to vector<4x16x32xf32>
    %23 = vector.extract_strided_slice %21 {offsets = [0, 1, 0], sizes = [4, 16, 32], strides = [1, 1, 1]} : vector<4x18x32xf32> to vector<4x16x32xf32>
    %24 = vector.extract_strided_slice %21 {offsets = [0, 2, 0], sizes = [4, 16, 32], strides = [1, 1, 1]} : vector<4x18x32xf32> to vector<4x16x32xf32>
    %25 = tpu.concatenate %22, %23, %24 in 2 : vector<4x16x32xf32>, vector<4x16x32xf32>, vector<4x16x32xf32> -> vector<4x16x96xf32>
    %26 = vector.shape_cast %25 : vector<4x16x96xf32> to vector<64x96xf32>
    %27 = arith.truncf %26 : vector<64x96xf32> to vector<64x96xbf16>
    %c0_9 = arith.constant 0 : index
    %c0_10 = arith.constant 0 : index
    %28 = vector.load %arg4[%c0_9, %c0_10] : memref<96x64xbf16, #tpu.memory_space<vmem>>, vector<96x64xbf16>
    %cst_11 = arith.constant dense<0.000000e+00> : vector<64x64xf32>
    %29 = tpu.matmul %27, %28, %cst_11 {dimension_numbers = #tpu.dot_dimension_numbers<[1], [0], [0], [1], [0, 0, 1, 1], [], []>} : vector<64x96xbf16>, vector<96x64xbf16>, vector<64x64xf32> -> vector<64x64xf32>
    %c0_12 = arith.constant 0 : index
    %c0_13 = arith.constant 0 : index
    %30 = vector.load %arg5[%c0_12, %c0_13] : memref<1x64xf32, #tpu.memory_space<vmem>>, vector<1x64xf32>
    %31 = vector.broadcast %30 : vector<1x64xf32> to vector<64x64xf32>
    %32 = arith.addf %29, %31 : vector<64x64xf32>
    %cst_14 = arith.constant 0.000000e+00 : f32
    %33 = vector.broadcast %cst_14 : f32 to vector<64x64xf32>
    %34 = arith.maximumf %32, %33 : vector<64x64xf32>
    %35 = vector.shape_cast %34 : vector<64x64xf32> to vector<4x16x64xf32>
    %cst_15 = arith.constant 0.000000e+00 : f32
    %36 = vector.broadcast %cst_15 : f32 to vector<4x1x64xf32>
    %37 = tpu.concatenate %36, %35, %36 in 1 : vector<4x1x64xf32>, vector<4x16x64xf32>, vector<4x1x64xf32> -> vector<4x18x64xf32>
    %38 = vector.extract_strided_slice %37 {offsets = [0, 0, 0], sizes = [4, 16, 64], strides = [1, 1, 1]} : vector<4x18x64xf32> to vector<4x16x64xf32>
    %39 = vector.extract_strided_slice %37 {offsets = [0, 1, 0], sizes = [4, 16, 64], strides = [1, 1, 1]} : vector<4x18x64xf32> to vector<4x16x64xf32>
    %40 = vector.extract_strided_slice %37 {offsets = [0, 2, 0], sizes = [4, 16, 64], strides = [1, 1, 1]} : vector<4x18x64xf32> to vector<4x16x64xf32>
    %41 = tpu.concatenate %38, %39, %40 in 2 : vector<4x16x64xf32>, vector<4x16x64xf32>, vector<4x16x64xf32> -> vector<4x16x192xf32>
    %42 = vector.shape_cast %41 : vector<4x16x192xf32> to vector<64x192xf32>
    %43 = arith.truncf %42 : vector<64x192xf32> to vector<64x192xbf16>
    %c0_16 = arith.constant 0 : index
    %c0_17 = arith.constant 0 : index
    %44 = vector.load %arg6[%c0_16, %c0_17] : memref<192x128xbf16, #tpu.memory_space<vmem>>, vector<192x128xbf16>
    %cst_18 = arith.constant dense<0.000000e+00> : vector<64x128xf32>
    %45 = tpu.matmul %43, %44, %cst_18 {dimension_numbers = #tpu.dot_dimension_numbers<[1], [0], [0], [1], [0, 0, 1, 1], [], []>} : vector<64x192xbf16>, vector<192x128xbf16>, vector<64x128xf32> -> vector<64x128xf32>
    %c0_19 = arith.constant 0 : index
    %c0_20 = arith.constant 0 : index
    %46 = vector.load %arg7[%c0_19, %c0_20] : memref<1x128xf32, #tpu.memory_space<vmem>>, vector<1x128xf32>
    %47 = vector.broadcast %46 : vector<1x128xf32> to vector<64x128xf32>
    %48 = arith.addf %45, %47 : vector<64x128xf32>
    %cst_21 = arith.constant 0.000000e+00 : f32
    %49 = vector.broadcast %cst_21 : f32 to vector<64x128xf32>
    %50 = arith.maximumf %48, %49 : vector<64x128xf32>
    %51 = vector.shape_cast %50 : vector<64x128xf32> to vector<4x16x128xf32>
    %c0_22 = arith.constant 0 : index
    %c0_23 = arith.constant 0 : index
    %c0_24 = arith.constant 0 : index
    %52 = vector.load %arg8[%c0_22, %c0_23, %c0_24] : memref<4x16x128xf32, #tpu.memory_space<vmem>>, vector<4x16x128xf32>
    tpu.vector_store %arg8[%c0_22, %c0_23, %c0_24], %51 {strides = array<i32>} : memref<4x16x128xf32, #tpu.memory_space<vmem>>, vector<4x16x128xf32>,
    return
  }
  func.func @transform_0(%arg0: i32) -> (i32, i32, i32) {
    %c0_i32 = arith.constant 0 : i32
    %c0_i32_0 = arith.constant 0 : i32
    %c0_i32_1 = arith.constant 0 : i32
    return %arg0, %c0_i32, %c0_i32_0 : i32, i32, i32
  }
  func.func @transform_1(%arg0: i32) -> (i32, i32) {
    %c0_i32 = arith.constant 0 : i32
    %c0_i32_0 = arith.constant 0 : i32
    %c0_i32_1 = arith.constant 0 : i32
    return %c0_i32, %c0_i32_0 : i32, i32
  }
  func.func @transform_2(%arg0: i32) -> (i32, i32) {
    %c0_i32 = arith.constant 0 : i32
    %c0_i32_0 = arith.constant 0 : i32
    %c0_i32_1 = arith.constant 0 : i32
    return %c0_i32, %c0_i32_0 : i32, i32
  }
  func.func @transform_3(%arg0: i32) -> (i32, i32) {
    %c0_i32 = arith.constant 0 : i32
    %c0_i32_0 = arith.constant 0 : i32
    %c0_i32_1 = arith.constant 0 : i32
    return %c0_i32, %c0_i32_0 : i32, i32
  }
  func.func @transform_4(%arg0: i32) -> (i32, i32) {
    %c0_i32 = arith.constant 0 : i32
    %c0_i32_0 = arith.constant 0 : i32
    %c0_i32_1 = arith.constant 0 : i32
    return %c0_i32, %c0_i32_0 : i32, i32
  }
  func.func @transform_5(%arg0: i32) -> (i32, i32) {
    %c0_i32 = arith.constant 0 : i32
    %c0_i32_0 = arith.constant 0 : i32
    %c0_i32_1 = arith.constant 0 : i32
    return %c0_i32, %c0_i32_0 : i32, i32
  }
  func.func @transform_6(%arg0: i32) -> (i32, i32) {
    %c0_i32 = arith.constant 0 : i32
    %c0_i32_0 = arith.constant 0 : i32
    %c0_i32_1 = arith.constant 0 : i32
    return %c0_i32, %c0_i32_0 : i32, i32
  }
  func.func @transform_7(%arg0: i32) -> (i32, i32, i32) {
    %c0_i32 = arith.constant 0 : i32
    %c0_i32_0 = arith.constant 0 : i32
    %c0_i32_1 = arith.constant 0 : i32
    return %arg0, %c0_i32, %c0_i32_0 : i32, i32, i32
  }
}

</mosaic_0001>

<bundles_post_ra>
// kernel: _convnet_pallas.1
= control target key start
LH: loop header
LB: loop body
LE: loop exit
PB: predicated region body
PF: predicated region fallthrough
CT: control target
= control target key end

     0   :  { %12 = vsyncpa [#allocation3], 0  ;;  %s2490_s0 = inlined_call_operand.vmem [shape: f32[8,6,16], index: 0, kind: input, shape index: {}]   ;;  %s2491_s1 = inlined_call_operand.vmem [shape: bf16[30,32], index: 1, kind: input, shape index: {}]   ;;  %s2492_s2 = inlined_call_operand.vmem [shape: f32[1,32], index: 2, kind: input, shape index: {}]   ;;  %s2493_s3 = inlined_call_operand.vmem [shape: bf16[96,64], index: 3, kind: input, shape index: {}]   ;;  %s2494_s4 = inlined_call_operand.vmem [shape: f32[1,64], index: 4, kind: input, shape index: {}]   ;;  %s2495_s5 = inlined_call_operand.vmem [shape: bf16[192,128], index: 5, kind: input, shape index: {}]   ;;  %s2496_s6 = inlined_call_operand.vmem [shape: f32[1,128], index: 6, kind: input, shape index: {}]   ;;  %s2497_s7 = inlined_call_operand.hbm [shape: f32[8,16,128], index: 7, kind: output, shape index: {}]  }
   0x1   :  { %14 = vsyncpa [#allocation3 + $0x1], 0  ;;  %s1948_s24 = smov 0   ;;  %s1950_s25 = smov 0  }
   0x2   :  { %s1952_s26 = smov 0   ;;  %s1954_s27 = smov 0  }
   0x3 LB: > { %s1969_s28 = sadd.s32 4294967295, %s1896_s27   ;;  %s1502_s29 = sadd.s32 4294967294, %s1896_s27   ;;  %s1896_s27 = sphi %s1954_s27, %s2503_s27   ;;  %s1892_s26 = sphi %s1952_s26, %s2502_s26   ;;  %s1888_s25 = sphi %s1950_s25, %s2501_s25   ;;  %s1884_s24 = sphi %s1948_s24, %s2500_s24  }
   0x4   : > { %s1973_s30 = sadd.s32 1, %s1896_s27   ;;  %s179_s8 = sadd.s32 1, %s1892_s26 }
   0x5   : > { %s176_s9 = ssub.s32 %s1896_s27, %s1973_s30  ;;  %p189_p0 = scmp.ne.s32.totalorder %s1892_s26, %s1888_s25 }
   0x6   : > { %p177_p1 = scmp.eq.s32.totalorder %s176_s9, 0  ;;  %p190_p2 = scmp.eq.s32.totalorder %s1969_s28, 1 }
   0x7   : > { %p195_p3 = scmp.ne.s32.totalorder %s1888_s25, %s1884_s24  ;;  %p196_p4 = scmp.eq.s32.totalorder %s1502_s29, 1 }
   0x8   : > { %s1984_s10 = scalar_select %p177_p1, %s1892_s26, %s179_s8  }
   0x9   : > { %p1986_p5 = por %p190_p2, %p189_p0  ;;  %p1990_p6 = por %p196_p4, %p195_p3 }
   0xa   : > { %p1505_p7 = scmp.ge.s32.totalorder %s1896_s27, 1  ;;  %p241_p8 = scmp.lt.s32.totalorder %s1896_s27, 3 }
   0xc   : > { %p242_p9 = pnand %p1505_p7, %p241_p8 }
   0xd   : > { %s1507_s13 = sshll.u32 (!%p242_p9), %s1969_s28, 2  ;;  %vm421_vm0 = vcmask (!%p242_p9), 1041408   ;;  %vm507_vm1 = vcmask (!%p242_p9), 1045504   ;;  %vm462_vm2 = vcmask (!%p242_p9), 1046528   ;;  %s1898_s18 = smov (!%p242_p9), 12   ;;  %vm552_vm3 = vcmask (!%p242_p9), 1044480  }
   0xe   : > { %245 = sbr.rel (%p242_p9) target bundleno = 1285 (0x505), region = 48  ;;  %p274_p10 = scmp.lt.s32.totalorder (!%p242_p9), %s1507_s13, 7  ;;  %vm597_vm4 = vcmask (!%p242_p9), 1043456   ;;  %vm642_vm5 = vcmask (!%p242_p9), 48128   ;;  %vm651_vm6 = vcmask (!%p242_p9), 97280   ;;  %vm660_vm7 = vcmask (!%p242_p9), 146432  }
   0xf   : > { %s1899_s19 = smov (!%p242_p9), 6   ;;  %s1900_s22 = smov (!%p242_p9), 18   ;;  %vm669_vm8 = vcmask (!%p242_p9), 195584   ;;  %vm704_vm9 = vcmask (!%p242_p9), 244736   ;;  %vm801_vm10 = vcmask (!%p242_p9), 1040384   ;;  %vm930_vm11 = vcmask (!%p242_p9), 261120  }
  0x10   : > { %s1901_s23 = smov (!%p242_p9), 24   ;;  %s1902_s9 = smov (!%p242_p9), 32   ;;  %vm939_vm12 = vcmask (!%p242_p9), 523264   ;;  %vm1007_vm13 = vcmask (!%p242_p9), 785408  }
  0x11   : > { %s1905_s29 = smov (!%p242_p9), [#allocation2]  }
  0x12   : > { %s1838_s8 = sshll.u32 (!%p242_p9), %s1905_s29, 4  ;;  %s1839_s8 = int_to_ptr.vmem [resolvable:$false] %s1838_s8 }
  0x15   : > { %s2505_s13 = smov (!%p274_p10, %s1507_s13), 7 }
  0x16   : > { %s1508_s14 = sshll.u32 %s2505_s13, 3  ;;  %s1903_s13 = smov 64  }
  0x17   : > { %s277_s17 = scalar_lea.vmem %s2490_s0, %s1508_s14 }
  0x18   : > { %v281_v0 = vld [vmem:[%s277_s17] sm:$0x3f]  ;;  %v282_v1 = vld [vmem:[%s277_s17 + $0x8] sm:$0x3f]  ;;  %v283_v2 = vld [vmem:[%s277_s17 + $0x10] sm:$0x3f] }
  0x19   : > { %v1650_v3 = vpack.i.bf16 %v282_v1, %v281_v0  ;;  %v284_v4 = vld [vmem:[%s277_s17 + $0x18] sm:$0x3f] }
  0x1a   : > { %v1662_v5 = vpack.i.bf16 %v284_v4, %v283_v2 }
  0x1b   : > { %1651 = vxpose.xlu0.b32.start.end [1/1] (short) (narrow) %v1650_v3, 16  ;;  %v1814_v3 = vld [vmem:[%s2491_s1] sm:$0xff]  }
  0x1c   : > { %1568 = vmatprep.subr.bf16.mxu1 %v1814_v3 }
  0x1d   : > { %1569 = vmatpush3.bf16.msra.mxu1 %v1814_v3 }
  0x20   : > { %1663 = vxpose.xlu0.b32.start.end [1/1] (short) (narrow) %v1662_v5, 16 }
  0x9b   : > { %v1652_v6 = vpop.trf.xlu0 }
  0x9c   : > { %v1656_v7 = vunpack.i.h.bf16 %v1652_v6  ;;  %v1653_v8 = vunpack.i.l.bf16 %v1652_v6 }
  0x9e   : > { %v425_v9 = vrot.slane %v1656_v7, 6  ;;  %v422_v10 = vrot.slane %v1653_v8, 6 }
  0x9f   : > { %v1657_v11 = vpop.trf.xlu0 }
  0xa0   : > { %v2001_v12 = vsel %vm421_vm0, 0.0, %v425_v9  ;;  %v2004_v13 = vsel %vm421_vm0, 0.0, %v422_v10  ;;  %v1661_v14 = vunpack.i.h.bf16 %v1657_v11  ;;  %v1658_v15 = vunpack.i.l.bf16 %v1657_v11 }
  0xa1   : > { %v513_v18 = vrot.slane %v2001_v12, 2  ;;  %v463_v19 = vrot.slane %v2004_v13, 1  ;;  %v468_v34 = vrot.slane %v2001_v12, 1  ;;  %v508_v42 = vrot.slane %v2004_v13, 2 }
  0xa2   : > { %v426_v16 = vrot.slane %v1661_v14, 6  ;;  %v423_v17 = vrot.slane %v1658_v15, 6  ;;  %v553_v54 = vrot.slane %v2004_v13, 3  ;;  %v558_v4 = vrot.slane %v2001_v12, 3 }
  0xa3   : > { %v1664_v20 = vpop.trf.xlu0 }
  0xa4   : > { %v2009_v21 = vsel %vm421_vm0, %v426_v16, 0.0  ;;  %v2012_v22 = vsel %vm421_vm0, %v425_v9, %v426_v16  ;;  %v1668_v23 = vunpack.i.h.bf16 %v1664_v20  ;;  %v2015_v24 = vsel %vm421_vm0, %v422_v10, %v423_v17 }
  0xa5   : > { %v2018_v25 = vsel %vm421_vm0, %v423_v17, 0.0  ;;  %v514_v26 = vrot.slane %v2012_v22, 2  ;;  %v516_v27 = vrot.slane %v2009_v21, 2  ;;  %v464_v28 = vrot.slane %v2015_v24, 1 }
  0xa6   : > { %v466_v29 = vrot.slane %v2018_v25, 1  ;;  %v469_v30 = vrot.slane %v2012_v22, 1  ;;  %v471_v31 = vrot.slane %v2009_v21, 1  ;;  %v509_v35 = vrot.slane %v2015_v24, 2 }
  0xa7   : > { %v515_v32 = vsel %vm507_vm1, %v513_v18, %v514_v26  ;;  %v517_v33 = vsel %vm507_vm1, %v514_v26, %v516_v27  ;;  %v465_v37 = vsel %vm462_vm2, %v463_v19, %v464_v28  ;;  %v511_v39 = vrot.slane %v2018_v25, 2  ;;  %v1669_v40 = vpop.trf.xlu0 }
  0xa8   : > { %v1689_v36 = vpack.i.bf16 %v517_v33, %v515_v32  ;;  %v467_v38 = vsel %vm462_vm2, %v464_v28, %v466_v29  ;;  %v470_v43 = vsel %vm462_vm2, %v468_v34, %v469_v30  ;;  %v472_v44 = vsel %vm462_vm2, %v469_v30, %v471_v31 }
  0xa9   : > { %v1674_v41 = vpack.i.bf16 %v467_v38, %v465_v37  ;;  %v431_v45 = vrot.slane %v1668_v23, 6  ;;  %v1673_v46 = vunpack.i.h.bf16 %v1669_v40  ;;  %v510_v47 = vsel %vm507_vm1, %v508_v42, %v509_v35  ;;  %v1815_v23 = vld [vmem:[%s2491_s1 + $0x8] sm:$0x7f]  }
  0xaa   : > { %1690 = vrot.lane.b32.xlu0 %v1689_v36, %s1898_s18  ;;  %v512_v48 = vsel %vm507_vm1, %v509_v35, %v511_v39  ;;  %v1679_v49 = vpack.i.bf16 %v472_v44, %v470_v43  ;;  %v554_v50 = vrot.slane %v2015_v24, 3  ;;  %v556_v51 = vrot.slane %v2018_v25, 3  ;;  %1600 = vmatprep.subr.msk.bf16.mxu1 %vm462_vm2, %v1815_v23 }
  0xab   : > { %1675 = vrot.lane.b32.xlu1 %v1674_v41, %s1899_s19  ;;  %v432_v52 = vrot.slane %v1673_v46, 6  ;;  %v2043_v53 = vsel %vm421_vm0, 0.0, %v431_v45  ;;  %v1684_v57 = vpack.i.bf16 %v512_v48, %v510_v47  ;;  %v1665_v58 = vunpack.i.l.bf16 %v1664_v20 }
  0xac   : > { %v555_v59 = vsel %vm552_vm3, %v553_v54, %v554_v50  ;;  %v557_v60 = vsel %vm552_vm3, %v554_v50, %v556_v51  ;;  %v1670_v61 = vunpack.i.l.bf16 %v1669_v40  ;;  %v613_v62 = vrot.slane %v2043_v53, 4 }
  0xad   : > { %v2048_v55 = vsel %vm421_vm0, %v432_v52, 0.0  ;;  %v2051_v56 = vsel %vm421_vm0, %v431_v45, %v432_v52  ;;  %v559_v63 = vrot.slane %v2012_v22, 3  ;;  %v561_v0 = vrot.slane %v2009_v21, 3 }
  0xae   : > { %v614_v1 = vrot.slane %v2051_v56, 4  ;;  %v616_v2 = vrot.slane %v2048_v55, 4  ;;  %v428_v7 = vrot.slane %v1665_v58, 6  ;;  %v1694_v8 = vpack.i.bf16 %v557_v60, %v555_v59 }
  0xaf   : > { %1680 = vrot.lane.b32.xlu1 %v1679_v49, %s1899_s19  ;;  %v429_v9 = vrot.slane %v1670_v61, 6  ;;  %v560_v11 = vsel %vm552_vm3, %v558_v4, %v559_v63  ;;  %v562_v14 = vsel %vm552_vm3, %v559_v63, %v561_v0  ;;  %v599_v15 = vrot.slane %v2015_v24, 4 }
  0xb0   : > { %v615_v5 = vsel %vm597_vm4, %v613_v62, %v614_v1  ;;  %v617_v6 = vsel %vm597_vm4, %v614_v1, %v616_v2  ;;  %v601_v16 = vrot.slane %v2018_v25, 4  ;;  %v598_v17 = vrot.slane %v2004_v13, 4 }
  0xb1   : > { %v1749_v10 = vpack.i.bf16 %v617_v6, %v615_v5  ;;  %v2075_v18 = vsel %vm421_vm0, 0.0, %v428_v7  ;;  %v2078_v19 = vsel %vm421_vm0, %v428_v7, %v429_v9  ;;  %v1699_v20 = vpack.i.bf16 %v562_v14, %v560_v11 }
  0xb2   : > { %v600_v25 = vsel %vm597_vm4, %v598_v17, %v599_v15  ;;  %v602_v26 = vsel %vm597_vm4, %v599_v15, %v601_v16  ;;  %v604_v27 = vrot.slane %v2012_v22, 4  ;;  %v606_v28 = vrot.slane %v2009_v21, 4 }
  0xb3   : > { %1685 = vrot.lane.b32.xlu1 %v1684_v57, %s1898_s18  ;;  %1750 = vrot.lane.b32.xlu0 %v1749_v10, %s1901_s23  ;;  %v452_v29 = vsel %vm421_vm0, %v429_v9, 0.0  ;;  %v603_v30 = vrot.slane %v2001_v12, 4  ;;  %v1704_v31 = vpack.i.bf16 %v602_v26, %v600_v25  ;;  %v473_v32 = vrot.slane %v2075_v18, 1 }
  0xb4   : > { %v474_v33 = vrot.slane %v2078_v19, 1  ;;  %v607_v35 = vsel %vm597_vm4, %v604_v27, %v606_v28  ;;  %v476_v36 = vrot.slane %v452_v29, 1  ;;  %v718_v21 = vsel %vm462_vm2, %v1815_v23, 0 }
  0xb5   : > { %v605_v34 = vsel %vm597_vm4, %v603_v30, %v604_v27  ;;  %1571 = vmatpush3.bf16.msra.mxu1 %v718_v21  ;;  %v478_v40 = vrot.slane %v2043_v53, 1  ;;  %v479_v41 = vrot.slane %v2051_v56, 1  ;;  %v481_v42 = vrot.slane %v2048_v55, 1 }
  0xb6   : > { %v1709_v37 = vpack.i.bf16 %v607_v35, %v605_v34  ;;  %v475_v38 = vsel %vm462_vm2, %v473_v32, %v474_v33  ;;  %v477_v39 = vsel %vm462_vm2, %v474_v33, %v476_v36  ;;  %v518_v44 = vrot.slane %v2075_v18, 2 }
  0xb7   : > { %1695 = vrot.lane.b32.xlu1 %v1694_v8, %s1900_s22  ;;  %v1714_v43 = vpack.i.bf16 %v477_v39, %v475_v38  ;;  %v480_v45 = vsel %vm462_vm2, %v478_v40, %v479_v41  ;;  %v482_v46 = vsel %vm462_vm2, %v479_v41, %v481_v42  ;;  %v519_v47 = vrot.slane %v2078_v19, 2 }
  0xb8   : > { %v521_v48 = vrot.slane %v452_v29, 2  ;;  %v1719_v49 = vpack.i.bf16 %v482_v46, %v480_v45  ;;  %v523_v50 = vrot.slane %v2043_v53, 2  ;;  %v524_v54 = vrot.slane %v2051_v56, 2 }
  0xb9   : > { %v520_v51 = vsel %vm507_vm1, %v518_v44, %v519_v47  ;;  %v526_v57 = vrot.slane %v2048_v55, 2  ;;  %v563_v59 = vrot.slane %v2075_v18, 3  ;;  %v564_v62 = vrot.slane %v2078_v19, 3 }
  0xba   : > { %v522_v52 = vsel %vm507_vm1, %v519_v47, %v521_v48  ;;  %v525_v60 = vsel %vm507_vm1, %v523_v50, %v524_v54  ;;  %v566_v63 = vrot.slane %v452_v29, 3  ;;  %v568_v1 = vrot.slane %v2043_v53, 3 }
  0xbb   : > { %1700 = vrot.lane.b32.xlu1 %v1699_v20, %s1900_s22  ;;  %v1724_v58 = vpack.i.bf16 %v522_v52, %v520_v51  ;;  %v527_v61 = vsel %vm507_vm1, %v524_v54, %v526_v57  ;;  %v565_v2 = vsel %vm552_vm3, %v563_v59, %v564_v62  ;;  %v569_v4 = vrot.slane %v2051_v56, 3 }
  0xbc   : > { %v1729_v0 = vpack.i.bf16 %v527_v61, %v525_v60  ;;  %v567_v3 = vsel %vm552_vm3, %v564_v62, %v566_v63  ;;  %v571_v5 = vrot.slane %v2048_v55, 3  ;;  %v608_v7 = vrot.slane %v2075_v18, 4 }
  0xbd   : > { %v1734_v6 = vpack.i.bf16 %v567_v3, %v565_v2  ;;  %v570_v8 = vsel %vm552_vm3, %v568_v1, %v569_v4  ;;  %v609_v10 = vrot.slane %v2078_v19, 4  ;;  %v611_v11 = vrot.slane %v452_v29, 4 }
  0xbe   : > { %v572_v9 = vsel %vm552_vm3, %v569_v4, %v571_v5 }
  0xbf   : > { %1705 = vrot.lane.b32.xlu1 %v1704_v31, %s1901_s23  ;;  %v1739_v14 = vpack.i.bf16 %v572_v9, %v570_v8  ;;  %v610_v15 = vsel %vm597_vm4, %v608_v7, %v609_v10  ;;  %v612_v16 = vsel %vm597_vm4, %v609_v10, %v611_v11 }
  0xc0   : > { %v1744_v55 = vpack.i.bf16 %v612_v16, %v610_v15 }
  0xc3   : > { %1710 = vrot.lane.b32.xlu1 %v1709_v37, %s1901_s23 }
  0xc7   : > { %1715 = vrot.lane.b32.xlu1 %v1714_v43, %s1899_s19 }
  0xcb   : > { %1720 = vrot.lane.b32.xlu1 %v1719_v49, %s1899_s19 }
  0xcf   : > { %1725 = vrot.lane.b32.xlu1 %v1724_v58, %s1898_s18 }
  0xd3   : > { %1730 = vrot.lane.b32.xlu1 %v1729_v0, %s1898_s18  ;;  %s1551_s18 = sshll.u32 %s1969_s28, 10 }
  0xd7   : > { %1735 = vrot.lane.b32.xlu1 %v1734_v6, %s1900_s22 }
  0xdb   : > { %1740 = vrot.lane.b32.xlu1 %v1739_v14, %s1900_s22  ;;  %s2441_s22 = scalar_lea.hbm %s2497_s7, %s1551_s18 }
  0xdf   : > { %1745 = vrot.lane.b32.xlu1 %v1744_v55, %s1901_s23 }
 0x11c   : > { %v1691_v35 = vpop.permute.xlu0 %1690 }
 0x11d   : > { %v1676_v17 = vpop.permute.xlu1 %1675  ;;  %v1692_v47 = vunpack.i.l.bf16 %v1691_v35 }
 0x11e   : > { %v1678_v26 = vunpack.i.h.bf16 %v1676_v17  ;;  %v1677_v27 = vunpack.i.l.bf16 %v1676_v17 }
 0x120   : > { %v644_v36 = vsel %vm642_vm5, %v2015_v24, %v1678_v26  ;;  %v643_v21 = vsel %vm642_vm5, %v2004_v13, %v1677_v27  ;;  %v1693_v13 = vunpack.i.h.bf16 %v1691_v35 }
 0x121   : > { %v1681_v20 = vpop.permute.xlu1 %1680 }
 0x122   : > { %v1683_v28 = vunpack.i.h.bf16 %v1681_v20  ;;  %v1682_v29 = vunpack.i.l.bf16 %v1681_v20 }
 0x124   : > { %v646_v37 = vsel %vm642_vm5, %v2012_v22, %v1683_v28  ;;  %v645_v38 = vsel %vm642_vm5, %v2001_v12, %v1682_v29 }
 0x125   : > { %v1686_v23 = vpop.permute.xlu1 %1685  ;;  %v654_v50 = vsel %vm651_vm6, %v645_v38, %v1692_v47  ;;  %v655_v51 = vsel %vm651_vm6, %v646_v37, %v1693_v13  ;;  %v1751_v14 = vpop.permute.xlu0 %1750 }
 0x126   : > { %v1688_v31 = vunpack.i.h.bf16 %v1686_v23  ;;  %v1687_v32 = vunpack.i.l.bf16 %v1686_v23  ;;  %v1752_v29 = vunpack.i.l.bf16 %v1751_v14 }
 0x128   : > { %v652_v40 = vsel %vm651_vm6, %v643_v21, %v1687_v32  ;;  %v653_v41 = vsel %vm651_vm6, %v644_v36, %v1688_v31 }
 0x129   : > { %v1696_v25 = vpop.permute.xlu1 %1695 }
 0x12a   : > { %v1698_v33 = vunpack.i.h.bf16 %v1696_v25  ;;  %v1697_v34 = vunpack.i.l.bf16 %v1696_v25 }
 0x12c   : > { %v661_v24 = vsel %vm660_vm7, %v652_v40, %v1697_v34  ;;  %v662_v46 = vsel %vm660_vm7, %v653_v41, %v1698_v33  ;;  %v1816_v41 = vld [vmem:[%s2493_s3] sm:$0xff]  }
 0x12d   : > { %v1701_v30 = vpop.permute.xlu1 %1700  ;;  %1580 = vmatprep.subr.bf16.mxu1 %v1816_v41 }
 0x12e   : > { %v1703_v44 = vunpack.i.h.bf16 %v1701_v30  ;;  %v1702_v45 = vunpack.i.l.bf16 %v1701_v30 }
 0x130   : > { %v663_v57 = vsel %vm660_vm7, %v654_v50, %v1702_v45  ;;  %v664_v58 = vsel %vm660_vm7, %v655_v51, %v1703_v44  ;;  %v1819_v44 = vld [vmem:[%s2493_s3 + $0x18] sm:$0xff]   ;;  %v2193_v45 = vld [vmem:[%s2492_s2] ss:$0 sm:$0xff] }
 0x131   : > { %v1706_v39 = vpop.permute.xlu1 %1705 }
 0x132   : > { %v1708_v42 = vunpack.i.h.bf16 %v1706_v39  ;;  %v1707_v43 = vunpack.i.l.bf16 %v1706_v39 }
 0x134   : > { %v670_v22 = vsel %vm669_vm8, %v661_v24, %v1707_v43  ;;  %v671_v48 = vsel %vm669_vm8, %v662_v46, %v1708_v42  ;;  %v1817_v42 = vld [vmem:[%s2493_s3 + $0x8] sm:$0xff]   ;;  %v1818_v43 = vld [vmem:[%s2493_s3 + $0x10] sm:$0xff]  }
 0x135   : > { %v1711_v12 = vpop.permute.xlu1 %1710  ;;  %v678_v49 = vpack.c.bf16 %v671_v48, %v670_v22 }
 0x136   : > { %v1713_v52 = vunpack.i.h.bf16 %v1711_v12  ;;  %v1712_v54 = vunpack.i.l.bf16 %v1711_v12 }
 0x137   : > { %1572 = vmatprep.mubr.msk.bf16.mxu1 %vm704_vm9, %v678_v49 }
 0x138   : > { %v672_v59 = vsel %vm669_vm8, %v663_v57, %v1712_v54  ;;  %v673_v60 = vsel %vm669_vm8, %v664_v58, %v1713_v52 }
 0x139   : > { %v679_v61 = vpack.c.bf16 %v673_v60, %v672_v59  ;;  %v1716_v62 = vpop.permute.xlu1 %1715  ;;  %v1820_v59 = vld [vmem:[%s2493_s3 + $0x20] sm:$0xff]  }
 0x13a   : > { %v1718_v7 = vunpack.i.h.bf16 %v1716_v62  ;;  %v1717_v8 = vunpack.i.l.bf16 %v1716_v62 }
 0x13b   : > { %1573 = vmatmul.mubr.msk.bf16.vlgmr.msra.gmra.mrb[0].mxu1 %vm704_vm9, %v679_v61 }
 0x13c   : > { %v647_v30 = vsel %vm642_vm5, %v2075_v18, %v1717_v8  ;;  %1581 = vmatpush3.bf16.msra.mxu1 %v1816_v41 }
 0x13d   : > { %v1721_v63 = vpop.permute.xlu1 %1720  ;;  %1582 = vmatprep.subr.bf16.mxu1 %v1817_v42 }
 0x13e   : > { %v1723_v2 = vunpack.i.h.bf16 %v1721_v63  ;;  %v1722_v3 = vunpack.i.l.bf16 %v1721_v63 }
 0x140   : > { %v650_v9 = vsel %vm642_vm5, %v2051_v56, %v1723_v2  ;;  %v649_v10 = vsel %vm642_vm5, %v2043_v53, %v1722_v3  ;;  %v1753_v56 = vunpack.i.h.bf16 %v1751_v14  ;;  %v648_v53 = vsel %vm642_vm5, %v2078_v19, %v1718_v7  ;;  %1583 = vmatpush3.bf16.msra.mxu1 %v1817_v42 }
 0x141   : > { %v1726_v0 = vpop.permute.xlu1 %1725  ;;  %1584 = vmatprep.subr.bf16.mxu1 %v1818_v43 }
 0x142   : > { %v1728_v15 = vunpack.i.h.bf16 %v1726_v0  ;;  %v1727_v16 = vunpack.i.l.bf16 %v1726_v0 }
 0x144   : > { %v656_v32 = vsel %vm651_vm6, %v647_v30, %v1727_v16  ;;  %v657_v33 = vsel %vm651_vm6, %v648_v53, %v1728_v15  ;;  %1585 = vmatpush3.bf16.msra.mxu1 %v1818_v43 }
 0x145   : > { %v1731_v1 = vpop.permute.xlu1 %1730  ;;  %1586 = vmatprep.subr.bf16.mxu1 %v1819_v44 }
 0x146   : > { %v1733_v5 = vunpack.i.h.bf16 %v1731_v1  ;;  %v1732_v6 = vunpack.i.l.bf16 %v1731_v1 }
 0x148   : > { %v658_v20 = vsel %vm651_vm6, %v649_v10, %v1732_v6  ;;  %v659_v23 = vsel %vm651_vm6, %v650_v9, %v1733_v5  ;;  %1587 = vmatpush3.bf16.msra.mxu1 %v1819_v44  ;;  %v1821_v10 = vld [vmem:[%s2493_s3 + $0x28] sm:$0xff]  }
 0x149   : > { %v1736_v4 = vpop.permute.xlu1 %1735  ;;  %1588 = vmatprep.subr.bf16.mxu1 %v1820_v59 }
 0x14a   : > { %v1738_v25 = vunpack.i.h.bf16 %v1736_v4  ;;  %v1737_v26 = vunpack.i.l.bf16 %v1736_v4 }
 0x14c   : > { %v665_v36 = vsel %vm660_vm7, %v656_v32, %v1737_v26  ;;  %v666_v21 = vsel %vm660_vm7, %v657_v33, %v1738_v25  ;;  %1589 = vmatpush3.bf16.msra.mxu1 %v1820_v59 }
 0x14d   : > { %v1741_v11 = vpop.permute.xlu1 %1740  ;;  %1590 = vmatprep.subr.bf16.mxu1 %v1821_v10 }
 0x14e   : > { %v1743_v55 = vunpack.i.h.bf16 %v1741_v11  ;;  %v1742_v17 = vunpack.i.l.bf16 %v1741_v11 }
 0x150   : > { %v667_v27 = vsel %vm660_vm7, %v658_v20, %v1742_v17  ;;  %v668_v28 = vsel %vm660_vm7, %v659_v23, %v1743_v55  ;;  %1591 = vmatpush3.bf16.msra.mxu1 %v1821_v10 }
 0x151   : > { %v1746_v31 = vpop.permute.xlu1 %1745  ;;  %v676_v37 = vsel %vm669_vm8, %v667_v27, %v1752_v29  ;;  %v677_v38 = vsel %vm669_vm8, %v668_v28, %v1753_v56 }
 0x152   : > { %v1748_v34 = vunpack.i.h.bf16 %v1746_v31  ;;  %v1747_v35 = vunpack.i.l.bf16 %v1746_v31  ;;  %v681_v40 = vpack.c.bf16 %v677_v38, %v676_v37 }
 0x154   : > { %v674_v19 = vsel %vm669_vm8, %v665_v36, %v1747_v35  ;;  %v675_v39 = vsel %vm669_vm8, %v666_v21, %v1748_v34 }
 0x155   : > { %v680_v18 = vpack.c.bf16 %v675_v39, %v674_v19 }
 0x157   : > { %1576 = vmatprep.mubr.msk.bf16.mxu1 %vm704_vm9, %v680_v18 }
 0x158   : > { %1577 = vmatmul.mubr.msk.bf16.gmra.mrb[4].mxu1 %vm704_vm9, %v681_v40 }
 0x20e   : > { %v1574_v24 = vpop.f32.mrb[0].mxu1 }
 0x20f   : > { %v763_v46 = vadd.f32 %v1574_v24, %v2193_v45  ;;  %v754_v13 = vpop.f32.mrb[1].mxu1 }
 0x210   : > { %v755_v47 = vadd.f32 %v2193_v45, %v754_v13  ;;  %v1575_v22 = vpop.f32.mrb[2].mxu1 }
 0x211   : > { %v787_v48 = vmax.f32 %v763_v46, 0.0  ;;  %v766_v12 = vadd.f32 %v1575_v22, %v2193_v45  ;;  %v757_v49 = vpop.f32.mrb[3].mxu1 }
 0x212   : > { %v785_v50 = vmax.f32 %v755_v47, 0.0  ;;  %v758_v51 = vadd.f32 %v2193_v45, %v757_v49 }
 0x213   : > { %v805_v52 = vrot.slane %v787_v48, 7  ;;  %v788_v54 = vmax.f32 %v766_v12, 0.0 }
 0x214   : > { %v802_v57 = vrot.slane %v785_v50, 7  ;;  %v786_v58 = vmax.f32 %v758_v51, 0.0 }
 0x215   : > { %v2203_v60 = vsel %vm801_vm10, 0.0, %v805_v52  ;;  %v806_v61 = vrot.slane %v788_v54, 7 }
 0x216   : > { %v2206_v62 = vsel %vm801_vm10, 0.0, %v802_v57  ;;  %v803_v63 = vrot.slane %v786_v58, 7  ;;  %v847_v2 = vrot.slane %v2203_v60, 1  ;;  %v891_v55 = vrot.slane %v2203_v60, 2 }
 0x217   : > { %v2209_v0 = vsel %vm801_vm10, %v805_v52, %v806_v61  ;;  %v831_v1 = vsel %vm801_vm10, %v806_v61, 0.0  ;;  %v842_v3 = vrot.slane %v2206_v62, 1  ;;  %v886_v23 = vrot.slane %v2206_v62, 2 }
 0x218   : > { %v848_v4 = vrot.slane %v2209_v0, 1  ;;  %v850_v5 = vrot.slane %v831_v1, 1  ;;  %v892_v6 = vrot.slane %v2209_v0, 2  ;;  %v894_v7 = vrot.slane %v831_v1, 2 }
 0x219   : > { %v2217_v8 = vsel %vm801_vm10, %v802_v57, %v803_v63  ;;  %v830_v9 = vsel %vm801_vm10, %v803_v63, 0.0 }
 0x21a   : > { %v843_v11 = vrot.slane %v2217_v8, 1  ;;  %v845_v14 = vrot.slane %v830_v9, 1  ;;  %v887_v15 = vrot.slane %v2217_v8, 2  ;;  %v889_v16 = vrot.slane %v830_v9, 2 }
 0x21b   : > { %v849_v17 = vsel %vm462_vm2, %v847_v2, %v848_v4  ;;  %v851_v20 = vsel %vm462_vm2, %v848_v4, %v850_v5  ;;  %v893_v56 = vsel %vm507_vm1, %v891_v55, %v892_v6  ;;  %v895_v29 = vsel %vm507_vm1, %v892_v6, %v894_v7 }
 0x21c   : > { %v1754_v25 = vpack.i.bf16 %v851_v20, %v849_v17  ;;  %v844_v26 = vsel %vm462_vm2, %v842_v3, %v843_v11  ;;  %v846_v27 = vsel %vm462_vm2, %v843_v11, %v845_v14  ;;  %v888_v53 = vsel %vm507_vm1, %v886_v23, %v887_v15 }
 0x21d   : > { %v1759_v28 = vpack.i.bf16 %v846_v27, %v844_v26  ;;  %v890_v30 = vsel %vm507_vm1, %v887_v15, %v889_v16  ;;  %v1769_v31 = vpack.i.bf16 %v895_v29, %v893_v56 }
 0x21e   : > { %1755 = vrot.lane.b32.xlu0 %v1754_v25, %s1902_s9  ;;  %v1764_v32 = vpack.i.bf16 %v890_v30, %v888_v53 }
 0x21f   : > { %1760 = vrot.lane.b32.xlu1 %v1759_v28, %s1902_s9 }
 0x222   : > { %1770 = vrot.lane.b32.xlu0 %v1769_v31, %s1903_s13 }
 0x223   : > { %1765 = vrot.lane.b32.xlu1 %v1764_v32, %s1903_s13 }
 0x22b   : > { %v1578_v33 = vpop.f32.mrb[4].mxu1 }
 0x22c   : > { %v779_v34 = vadd.f32 %v1578_v33, %v2193_v45  ;;  %v770_v35 = vpop.f32.mrb[5].mxu1 }
 0x22d   : > { %v771_v36 = vadd.f32 %v2193_v45, %v770_v35  ;;  %v1579_v21 = vpop.f32.mrb[6].mxu1 }
 0x22e   : > { %v791_v37 = vmax.f32 %v779_v34, 0.0  ;;  %v782_v38 = vadd.f32 %v1579_v21, %v2193_v45  ;;  %v773_v19 = vpop.f32.mrb[7].mxu1 }
 0x22f   : > { %v789_v39 = vmax.f32 %v771_v36, 0.0  ;;  %v774_v18 = vadd.f32 %v2193_v45, %v773_v19 }
 0x230   : > { %v811_v40 = vrot.slane %v791_v37, 7  ;;  %v792_v41 = vmax.f32 %v782_v38, 0.0 }
 0x231   : > { %v808_v42 = vrot.slane %v789_v39, 7  ;;  %v790_v43 = vmax.f32 %v774_v18, 0.0 }
 0x232   : > { %v2244_v44 = vsel %vm801_vm10, 0.0, %v811_v40  ;;  %v812_v24 = vrot.slane %v792_v41, 7 }
 0x233   : > { %v2247_v46 = vsel %vm801_vm10, 0.0, %v808_v42  ;;  %v809_v13 = vrot.slane %v790_v43, 7  ;;  %v857_v48 = vrot.slane %v2244_v44, 1  ;;  %v901_v63 = vrot.slane %v2244_v44, 2 }
 0x234   : > { %v2250_v47 = vsel %vm801_vm10, %v811_v40, %v812_v24  ;;  %v833_v22 = vsel %vm801_vm10, %v812_v24, 0.0  ;;  %v852_v45 = vrot.slane %v2247_v46, 1  ;;  %v896_v3 = vrot.slane %v2247_v46, 2 }
 0x235   : > { %v858_v12 = vrot.slane %v2250_v47, 1  ;;  %v860_v49 = vrot.slane %v833_v22, 1  ;;  %v902_v50 = vrot.slane %v2250_v47, 2  ;;  %v904_v51 = vrot.slane %v833_v22, 2 }
 0x236   : > { %v2258_v52 = vsel %vm801_vm10, %v808_v42, %v809_v13  ;;  %v832_v54 = vsel %vm801_vm10, %v809_v13, 0.0 }
 0x237   : > { %v853_v57 = vrot.slane %v2258_v52, 1  ;;  %v855_v58 = vrot.slane %v832_v54, 1  ;;  %v897_v59 = vrot.slane %v2258_v52, 2  ;;  %v899_v61 = vrot.slane %v832_v54, 2 }
 0x238   : > { %v859_v1 = vsel %vm462_vm2, %v857_v48, %v858_v12  ;;  %v861_v2 = vsel %vm462_vm2, %v858_v12, %v860_v49  ;;  %v903_v9 = vsel %vm507_vm1, %v901_v63, %v902_v50  ;;  %v905_v10 = vsel %vm507_vm1, %v902_v50, %v904_v51  ;;  %v1827_v63 = vld [vmem:[%s2495_s5 + $0x28] sm:$0xff]  }
 0x239   : > { %v1774_v4 = vpack.i.bf16 %v861_v2, %v859_v1  ;;  %v854_v5 = vsel %vm462_vm2, %v852_v45, %v853_v57  ;;  %v856_v6 = vsel %vm462_vm2, %v853_v57, %v855_v58  ;;  %v898_v11 = vsel %vm507_vm1, %v896_v3, %v897_v59  ;;  %v1824_v58 = vld [vmem:[%s2495_s5 + $0x10] sm:$0xff]   ;;  %v1829_v2 = vld [vmem:[%s2495_s5 + $0x38] sm:$0xff]   ;;  %v1830_v3 = vld [vmem:[%s2495_s5 + $0x40] sm:$0xff]  }
 0x23a   : > { %v1779_v7 = vpack.i.bf16 %v856_v6, %v854_v5  ;;  %v900_v14 = vsel %vm507_vm1, %v897_v59, %v899_v61  ;;  %v1789_v15 = vpack.i.bf16 %v905_v10, %v903_v9  ;;  %v1825_v59 = vld [vmem:[%s2495_s5 + $0x18] sm:$0xff]   ;;  %v1826_v61 = vld [vmem:[%s2495_s5 + $0x20] sm:$0xff]   ;;  %v1828_v1 = vld [vmem:[%s2495_s5 + $0x30] sm:$0xff]  }
 0x23b   : > { %1775 = vrot.lane.b32.xlu0 %v1774_v4, %s1902_s9  ;;  %v1784_v16 = vpack.i.bf16 %v900_v14, %v898_v11  ;;  %v1831_v4 = vld [vmem:[%s2495_s5 + $0x48] sm:$0xff]   ;;  %v1832_v5 = vld [vmem:[%s2495_s5 + $0x50] sm:$0xff]   ;;  %v1516_v6 = vld [vmem:[%s2494_s4] ss:$0 sm:$0xff] }
 0x23c   : > { %1780 = vrot.lane.b32.xlu1 %v1779_v7, %s1902_s9  ;;  %s1840_s9 = scalar_lea.vmem %s1839_s8, 2048 }
 0x23f   : > { %1790 = vrot.lane.b32.xlu0 %v1789_v15, %s1903_s13 }
 0x240   : > { %1785 = vrot.lane.b32.xlu1 %v1784_v16, %s1903_s13 }
 0x290   : > { %v1756_v55 = vpop.permute.xlu0 %1755 }
 0x291   : > { %v1761_v17 = vpop.permute.xlu1 %1760  ;;  %v1758_v20 = vunpack.i.h.bf16 %v1756_v55  ;;  %v1757_v23 = vunpack.i.l.bf16 %v1756_v55 }
 0x292   : > { %v1763_v25 = vunpack.i.h.bf16 %v1761_v17  ;;  %v1762_v26 = vunpack.i.l.bf16 %v1761_v17 }
 0x293   : > { %v934_v53 = vsel %vm930_vm11, %v2209_v0, %v1758_v20  ;;  %v933_v30 = vsel %vm930_vm11, %v2203_v60, %v1757_v23  ;;  %v1833_v23 = vld [vmem:[%s2495_s5 + $0x58] sm:$0xff]  }
 0x294   : > { %v1771_v27 = vpop.permute.xlu0 %1770  ;;  %v932_v33 = vsel %vm930_vm11, %v2217_v8, %v1763_v25  ;;  %v931_v34 = vsel %vm930_vm11, %v2206_v62, %v1762_v26 }
 0x295   : > { %v1773_v28 = vunpack.i.h.bf16 %v1771_v27  ;;  %v1772_v56 = vunpack.i.l.bf16 %v1771_v27  ;;  %v1766_v29 = vpop.permute.xlu1 %1765 }
 0x296   : > { %v1768_v31 = vunpack.i.h.bf16 %v1766_v29  ;;  %v1767_v32 = vunpack.i.l.bf16 %v1766_v29 }
 0x297   : > { %v942_v35 = vsel %vm939_vm12, %v933_v30, %v1772_v56  ;;  %v943_v36 = vsel %vm939_vm12, %v934_v53, %v1773_v28 }
 0x298   : > { %v940_v21 = vsel %vm939_vm12, %v931_v34, %v1767_v32  ;;  %v941_v37 = vsel %vm939_vm12, %v932_v33, %v1768_v31  ;;  %v949_v38 = vpack.c.bf16 %v943_v36, %v942_v35 }
 0x299   : > { %v948_v0 = vpack.c.bf16 %v941_v37, %v940_v21 }
 0x29b   : > { %1592 = vmatprep.mubr.msk.bf16.mxu1 %vm1007_vm13, %v948_v0 }
 0x29c   : > { %1593 = vmatmul.mubr.msk.bf16.vlgmr.msra.gmra.mrb[8].mxu1 %vm1007_vm13, %v949_v38 }
 0x2ad   : > { %v1776_v60 = vpop.permute.xlu0 %1775 }
 0x2ae   : > { %v1781_v8 = vpop.permute.xlu1 %1780  ;;  %v1778_v19 = vunpack.i.h.bf16 %v1776_v60  ;;  %v1777_v39 = vunpack.i.l.bf16 %v1776_v60 }
 0x2af   : > { %v1783_v62 = vunpack.i.h.bf16 %v1781_v8  ;;  %v1782_v18 = vunpack.i.l.bf16 %v1781_v8 }
 0x2b0   : > { %v938_v24 = vsel %vm930_vm11, %v2250_v47, %v1778_v19  ;;  %v937_v13 = vsel %vm930_vm11, %v2244_v44, %v1777_v39  ;;  %v1822_v44 = vld [vmem:[%s2495_s5] sm:$0xff]  }
 0x2b1   : > { %v1791_v40 = vpop.permute.xlu0 %1790  ;;  %v936_v45 = vsel %vm930_vm11, %v2258_v52, %v1783_v62  ;;  %v935_v12 = vsel %vm930_vm11, %v2247_v46, %v1782_v18  ;;  %v1904_v52 = vmov 0   ;;  %v1823_v46 = vld [vmem:[%s2495_s5 + $0x8] sm:$0xff]  }
 0x2b2   : > { %v1793_v41 = vunpack.i.h.bf16 %v1791_v40  ;;  %v1792_v42 = vunpack.i.l.bf16 %v1791_v40  ;;  %v1786_v43 = vpop.permute.xlu1 %1785  ;;  %1344 = vmatprep.subr.bf16.mxu0 %v1904_v52 }
 0x2b3   : > { %v1788_v22 = vunpack.i.h.bf16 %v1786_v43  ;;  %v1787_v48 = vunpack.i.l.bf16 %v1786_v43  ;;  %1345 = vmatpush1.bf16.msra.mxu0 %v1822_v44 }
 0x2b4   : > { %v946_v49 = vsel %vm939_vm12, %v937_v13, %v1792_v42  ;;  %v947_v50 = vsel %vm939_vm12, %v938_v24, %v1793_v41  ;;  %1346 = vmatprep.subr.bf16.mxu0 %v1904_v52 }
 0x2b5   : > { %v944_v51 = vsel %vm939_vm12, %v935_v12, %v1787_v48  ;;  %v945_v54 = vsel %vm939_vm12, %v936_v45, %v1788_v22  ;;  %v951_v57 = vpack.c.bf16 %v947_v50, %v946_v49 }
 0x2b6   : > { %v950_v47 = vpack.c.bf16 %v945_v54, %v944_v51 }
 0x2b7   : > { %1347 = vmatpush1.bf16.msra.mxu0 %v1823_v46 }
 0x2b8   : > { %1596 = vmatprep.mubr.msk.bf16.mxu1 %vm1007_vm13, %v950_v47  ;;  %1348 = vmatprep.subr.bf16.mxu0 %v1904_v52 }
 0x2b9   : > { %1597 = vmatmul.mubr.msk.bf16.gmra.mrb[12].mxu1 %vm1007_vm13, %v951_v57 }
 0x2bb   : > { %1349 = vmatpush1.bf16.msra.mxu0 %v1824_v58 }
 0x2bc   : > { %1350 = vmatprep.subr.bf16.mxu0 %v1904_v52 }
 0x2bf   : > { %1351 = vmatpush1.bf16.msra.mxu0 %v1825_v59 }
 0x2c0   : > { %1352 = vmatprep.subr.bf16.mxu0 %v1904_v52 }
 0x2c3   : > { %1353 = vmatpush1.bf16.msra.mxu0 %v1826_v61 }
 0x2c4   : > { %1354 = vmatprep.subr.bf16.mxu0 %v1904_v52 }
 0x2c7   : > { %1355 = vmatpush1.bf16.msra.mxu0 %v1827_v63 }
 0x2c8   : > { %1356 = vmatprep.subr.bf16.mxu0 %v1904_v52 }
 0x2cb   : > { %1357 = vmatpush1.bf16.msra.mxu0 %v1828_v1 }
 0x2cc   : > { %1358 = vmatprep.subr.bf16.mxu0 %v1904_v52 }
 0x2cf   : > { %1359 = vmatpush1.bf16.msra.mxu0 %v1829_v2 }
 0x2d0   : > { %1360 = vmatprep.subr.bf16.mxu0 %v1904_v52 }
 0x2d3   : > { %1361 = vmatpush1.bf16.msra.mxu0 %v1830_v3 }
 0x2d4   : > { %1362 = vmatprep.subr.bf16.mxu0 %v1904_v52 }
 0x2d7   : > { %1363 = vmatpush1.bf16.msra.mxu0 %v1831_v4 }
 0x2d8   : > { %1364 = vmatprep.subr.bf16.mxu0 %v1904_v52 }
 0x2db   : > { %1365 = vmatpush1.bf16.msra.mxu0 %v1832_v5 }
 0x2dc   : > { %1366 = vmatprep.subr.bf16.mxu0 %v1904_v52 }
 0x2df   : > { %1367 = vmatpush1.bf16.msra.mxu0 %v1833_v23 }
 0x36f   : > { %v1594_v7 = vpop.f32.mrb[8].mxu1 }
 0x370   : > { %v1063_v9 = vadd.f32 %v1594_v7, %v1516_v6  ;;  %v1054_v10 = vpop.f32.mrb[9].mxu1 }
 0x371   : > { %v1055_v11 = vadd.f32 %v1516_v6, %v1054_v10  ;;  %v1595_v14 = vpop.f32.mrb[10].mxu1 }
 0x372   : > { %v1087_v15 = vmax.f32 %v1063_v9, 0.0  ;;  %v1066_v16 = vadd.f32 %v1595_v14, %v1516_v6  ;;  %v1057_v55 = vpop.f32.mrb[11].mxu1 }
 0x373   : > { %v1085_v17 = vmax.f32 %v1055_v11, 0.0  ;;  %v1058_v20 = vadd.f32 %v1516_v6, %v1057_v55 }
 0x374   : > { %v1104_v25 = vrot.slane %v1087_v15, 7  ;;  %v1088_v26 = vmax.f32 %v1066_v16, 0.0 }
 0x375   : > { %v1101_v27 = vrot.slane %v1085_v17, 7  ;;  %v1086_v28 = vmax.f32 %v1058_v20, 0.0 }
 0x376   : > { %v2345_v56 = vsel %vm801_vm10, 0.0, %v1104_v25  ;;  %v1105_v29 = vrot.slane %v1088_v26, 7 }
 0x377   : > { %v2348_v53 = vsel %vm801_vm10, 0.0, %v1101_v27  ;;  %v1102_v30 = vrot.slane %v1086_v28, 7  ;;  %v1146_v33 = vrot.slane %v2345_v56, 1 }
 0x378   : > { %v2351_v31 = vsel %vm801_vm10, %v1104_v25, %v1105_v29  ;;  %v2354_v32 = vsel %vm801_vm10, %v1105_v29, 0.0  ;;  %v1141_v36 = vrot.slane %v2348_v53, 1  ;;  %v1185_v19 = vrot.slane %v2348_v53, 2 }
 0x379   : > { %v1147_v34 = vrot.slane %v2351_v31, 1  ;;  %v1149_v35 = vrot.slane %v2354_v32, 1  ;;  %v2361_v21 = vsel %vm801_vm10, %v1101_v27, %v1102_v30  ;;  %v1129_v37 = vsel %vm801_vm10, %v1102_v30, 0.0 }
 0x37a   : > { %v1142_v0 = vrot.slane %v2361_v21, 1  ;;  %v1144_v38 = vrot.slane %v1129_v37, 1  ;;  %v1188_v60 = vrot.slane %v1129_v37, 2  ;;  %v1186_v62 = vrot.slane %v2361_v21, 2 }
 0x37b   : > { %v1148_v8 = vsel %vm462_vm2, %v1146_v33, %v1147_v34  ;;  %v1150_v39 = vsel %vm462_vm2, %v1147_v34, %v1149_v35  ;;  %v1191_v25 = vrot.slane %v2351_v31, 2  ;;  %v1193_v26 = vrot.slane %v2354_v32, 2 }
 0x37c   : > { %v1799_v18 = vpack.i.bf16 %v1150_v39, %v1148_v8  ;;  %v1143_v40 = vsel %vm462_vm2, %v1141_v36, %v1142_v0  ;;  %v1145_v41 = vsel %vm462_vm2, %v1142_v0, %v1144_v38  ;;  %v1187_v42 = vsel %vm507_vm1, %v1185_v19, %v1186_v62 }
 0x37d   : > { %v1189_v43 = vsel %vm507_vm1, %v1186_v62, %v1188_v60  ;;  %v1794_v24 = vpack.i.bf16 %v1145_v41, %v1143_v40  ;;  %v1190_v27 = vrot.slane %v2345_v56, 2  ;;  %v1194_v35 = vsel %vm507_vm1, %v1191_v25, %v1193_v26 }
 0x37e   : > { %1800 = vrot.lane.b32.xlu0 %v1799_v18, %s1903_s13  ;;  %v1222_v13 = vpack.c.bf16 %v1189_v43, %v1187_v42 }
 0x37f   : > { %1795 = vrot.lane.b32.xlu1 %v1794_v24, %s1903_s13  ;;  %v1192_v34 = vsel %vm507_vm1, %v1190_v27, %v1191_v25 }
 0x380   : > { %1540 = vmatprep.mubr.msk.bf16.mxu0 %vm939_vm12, %v1222_v13  ;;  %v1224_v32 = vpack.c.bf16 %v1194_v35, %v1192_v34 }
 0x38c   : > { %v1598_v22 = vpop.f32.mrb[12].mxu1 }
 0x38d   : > { %v1079_v48 = vadd.f32 %v1598_v22, %v1516_v6  ;;  %v1070_v45 = vpop.f32.mrb[13].mxu1 }
 0x38e   : > { %v1071_v12 = vadd.f32 %v1516_v6, %v1070_v45  ;;  %v1599_v49 = vpop.f32.mrb[14].mxu1 }
 0x38f   : > { %v1091_v50 = vmax.f32 %v1079_v48, 0.0  ;;  %v1082_v51 = vadd.f32 %v1599_v49, %v1516_v6  ;;  %v1073_v54 = vpop.f32.mrb[15].mxu1 }
 0x390   : > { %v1089_v47 = vmax.f32 %v1071_v12, 0.0  ;;  %v1074_v57 = vadd.f32 %v1516_v6, %v1073_v54 }
 0x391   : > { %v1110_v44 = vrot.slane %v1091_v50, 7  ;;  %v1092_v52 = vmax.f32 %v1082_v51, 0.0 }
 0x392   : > { %v1107_v46 = vrot.slane %v1089_v47, 7  ;;  %v1090_v58 = vmax.f32 %v1074_v57, 0.0 }
 0x393   : > { %v1111_v59 = vrot.slane %v1092_v52, 7  ;;  %v2377_v61 = vsel %vm801_vm10, 0.0, %v1110_v44 }
 0x394   : > { %v1108_v63 = vrot.slane %v1090_v58, 7  ;;  %v1127_v1 = vsel %vm801_vm10, 0.0, %v1107_v46  ;;  %v1156_v6 = vrot.slane %v2377_v61, 1  ;;  %v1200_v24 = vrot.slane %v2377_v61, 2 }
 0x395   : > { %v2381_v2 = vsel %vm801_vm10, %v1110_v44, %v1111_v59  ;;  %v1132_v3 = vsel %vm801_vm10, %v1111_v59, 0.0  ;;  %v1151_v10 = vrot.slane %v1127_v1, 1  ;;  %v1195_v39 = vrot.slane %v1127_v1, 2 }
 0x396   : > { %v1157_v4 = vrot.slane %v2381_v2, 1  ;;  %v1159_v5 = vrot.slane %v1132_v3, 1  ;;  %v1109_v7 = vsel %vm801_vm10, %v1107_v46, %v1108_v63  ;;  %v1131_v9 = vsel %vm801_vm10, %v1108_v63, 0.0  ;;  %v1527_v46 = vld [vmem:[%s2496_s6] ss:$0 sm:$0xff] }
 0x397   : > { %v1152_v11 = vrot.slane %v1109_v7, 1  ;;  %v1154_v14 = vrot.slane %v1131_v9, 1  ;;  %v1196_v8 = vrot.slane %v1109_v7, 2  ;;  %v1198_v19 = vrot.slane %v1131_v9, 2 }
 0x398   : > { %v1158_v15 = vsel %vm462_vm2, %v1156_v6, %v1157_v4  ;;  %v1160_v16 = vsel %vm462_vm2, %v1157_v4, %v1159_v5  ;;  %v1201_v42 = vrot.slane %v2381_v2, 2  ;;  %v1203_v43 = vrot.slane %v1132_v3, 2 }
 0x399   : > { %v1809_v55 = vpack.i.bf16 %v1160_v16, %v1158_v15  ;;  %v1153_v17 = vsel %vm462_vm2, %v1151_v10, %v1152_v11  ;;  %v1155_v20 = vsel %vm462_vm2, %v1152_v11, %v1154_v14 }
 0x39a   : > { %v1804_v23 = vpack.i.bf16 %v1155_v20, %v1153_v17  ;;  %v1204_v45 = vsel %vm507_vm1, %v1201_v42, %v1203_v43 }
 0x39b   : > { %1810 = vrot.lane.b32.xlu0 %v1809_v55, %s1903_s13 }
 0x39c   : > { %1805 = vrot.lane.b32.xlu1 %v1804_v23, %s1903_s13  ;;  %s270_s13 = sand.u32 1, %s1888_s25  }
 0x39d   : > { %s1506_s16 = sshll.u32 %s270_s13, 6  ;;  %s2449_s28 = scalar_lea.sflag [#allocation3], %s270_s13 }
 0x39e   : > { %s2428_s17 = scalar_lea.vmem [#allocation2], %s1506_s16 }
 0x39f   : > { %s1440_s19 = sshll.u32 %s2428_s17, 4  ;;  %s2443_s19 = int_to_ptr.vmem [resolvable:$true] %s1440_s19 }
 0x3a0   : > { %s1834_s23 = scalar_lea.vmem %s2443_s19, 1024  ;;  %p1841_p0 = scmp.lt.s32.totalorder %s2443_s19, %s1839_s8 }
 0x3a1   : > { %p1835_p11 = scmp.ne.s32.totalorder %s2443_s19, %s1834_s23  ;;  %p1842_p1 = scmp.lt.s32.totalorder %s1840_s9, %s1834_s23 }
 0x3a3   : > { %p1836_p12 = pnand %p1835_p11, %p1986_p5  ;;  %p1843_p2 = por %p1842_p1, %p1841_p0 }
 0x3a5   : > { %p1837_p13 = pneg %p1836_p12 }
 0x3a7   : > { %p1844_p3 = pnand %p1843_p2, %p1837_p13 }
 0x3f0   : > { %v1801_v33 = vpop.permute.xlu0 %1800 }
 0x3f1   : > { %v1796_v28 = vpop.permute.xlu1 %1795  ;;  %v1803_v38 = vunpack.i.h.bf16 %v1801_v33  ;;  %v1802_v60 = vunpack.i.l.bf16 %v1801_v33 }
 0x3f2   : > { %v1798_v29 = vunpack.i.h.bf16 %v1796_v28  ;;  %v1797_v30 = vunpack.i.l.bf16 %v1796_v28 }
 0x3f3   : > { %v1215_v62 = vsel %vm939_vm12, %v2345_v56, %v1802_v60  ;;  %v1216_v18 = vsel %vm939_vm12, %v2351_v31, %v1803_v38  ;;  %v1202_v31 = vsel %vm507_vm1, %v1200_v24, %v1201_v42 }
 0x3f4   : > { %v1213_v36 = vsel %vm939_vm12, %v2348_v53, %v1797_v30  ;;  %v1214_v37 = vsel %vm939_vm12, %v2361_v21, %v1798_v29  ;;  %v1197_v53 = vsel %vm507_vm1, %v1195_v39, %v1196_v8  ;;  %v1199_v21 = vsel %vm507_vm1, %v1196_v8, %v1198_v19 }
 0x3f5   : > { %v1221_v0 = vpack.c.bf16 %v1214_v37, %v1213_v36  ;;  %v1223_v40 = vpack.c.bf16 %v1216_v18, %v1215_v62  ;;  %v1226_v41 = vpack.c.bf16 %v1199_v21, %v1197_v53  ;;  %v1228_v47 = vpack.c.bf16 %v1204_v45, %v1202_v31 }
 0x3f7   : > { %1377 = vmatmul.mubr.bf16.vlgmr.msra.gmra.mrb[0].mxu0 %v1221_v0 }
 0x3f8   : > { %1541 = vmatprep.mubr.msk.bf16.mxu0 %vm939_vm12, %v1224_v32 }
 0x3ff   : > { %1385 = vmatmul.mubr.bf16.gmra.mrb[4].mxu0 %v1223_v40 }
 0x400   : > { %1542 = vmatprep.mubr.msk.bf16.mxu0 %vm939_vm12, %v1226_v41 }
 0x40d   : > { %v1811_v48 = vpop.permute.xlu0 %1810 }
 0x40e   : > { %v1806_v13 = vpop.permute.xlu1 %1805  ;;  %v1813_v51 = vunpack.i.h.bf16 %v1811_v48  ;;  %v1812_v54 = vunpack.i.l.bf16 %v1811_v48 }
 0x40f   : > { %v1808_v22 = vunpack.i.h.bf16 %v1806_v13  ;;  %v1807_v56 = vunpack.i.l.bf16 %v1806_v13 }
 0x410   : > { %v1219_v57 = vsel %vm939_vm12, %v2377_v61, %v1812_v54  ;;  %v1220_v44 = vsel %vm939_vm12, %v2381_v2, %v1813_v51 }
 0x411   : > { %v1217_v12 = vsel %vm939_vm12, %v1127_v1, %v1807_v56  ;;  %v1218_v49 = vsel %vm939_vm12, %v1109_v7, %v1808_v22  ;;  %v1227_v52 = vpack.c.bf16 %v1220_v44, %v1219_v57 }
 0x412   : > { %v1225_v50 = vpack.c.bf16 %v1218_v49, %v1217_v12 }
 0x414   : > { %1393 = vmatmul.mubr.bf16.gmra.mrb[8].mxu0 %v1225_v50 }
 0x415   : > { %1543 = vmatprep.mubr.msk.bf16.mxu0 %vm939_vm12, %v1228_v47 }
 0x41c   : > { %1401 = vmatmul.mubr.bf16.gmra.mrb[12].mxu0 %v1227_v52 }
 0x4ca   : > { %v1378_v58 = vpop.f32.mrb[0].mxu0 }
 0x4cb   : > { %v1379_v59 = vadd.f32 %v1527_v46, %v1378_v58  ;;  %v1380_v63 = vpop.f32.mrb[1].mxu0 }
 0x4cc   : > { %v1381_v1 = vpop.f32.mrb[2].mxu0 }
 0x4cd   : > { %v1409_v3 = vmax.f32 %v1379_v59, 0.0  ;;  %v1382_v4 = vadd.f32 %v1527_v46, %v1381_v1  ;;  %v1383_v5 = vpop.f32.mrb[3].mxu0 }
 0x4cf   : > { %1417 = vst [vmem:[%s2428_s17] sm:$0xff] %v1409_v3  ;;  %v1410_v61 = vmax.f32 %v1382_v4, 0.0 }
 0x4d1   : > { %1418 = vst [vmem:[%s2428_s17 + $0x8] sm:$0xff] %v1410_v61 }
 0x4d2   : > { %v1386_v2 = vpop.f32.mrb[4].mxu0 }
 0x4d3   : > { %v1387_v6 = vadd.f32 %v1527_v46, %v1386_v2  ;;  %v1388_v7 = vpop.f32.mrb[5].mxu0 }
 0x4d4   : > { %v1389_v9 = vpop.f32.mrb[6].mxu0 }
 0x4d5   : > { %v1411_v10 = vmax.f32 %v1387_v6, 0.0  ;;  %v1390_v11 = vadd.f32 %v1527_v46, %v1389_v9  ;;  %v1391_v14 = vpop.f32.mrb[7].mxu0 }
 0x4d7   : > { %1419 = vst [vmem:[%s2428_s17 + $0x10] sm:$0xff] %v1411_v10  ;;  %v1412_v15 = vmax.f32 %v1390_v11, 0.0 }
 0x4d9   : > { %1420 = vst [vmem:[%s2428_s17 + $0x18] sm:$0xff] %v1412_v15 }
 0x4e7   : > { %v1394_v16 = vpop.f32.mrb[8].mxu0 }
 0x4e8   : > { %v1395_v55 = vadd.f32 %v1527_v46, %v1394_v16  ;;  %v1396_v17 = vpop.f32.mrb[9].mxu0 }
 0x4e9   : > { %v1397_v20 = vpop.f32.mrb[10].mxu0 }
 0x4ea   : > { %v1413_v23 = vmax.f32 %v1395_v55, 0.0  ;;  %v1398_v25 = vadd.f32 %v1527_v46, %v1397_v20  ;;  %v1399_v26 = vpop.f32.mrb[11].mxu0 }
 0x4ec   : > { %1421 = vst [vmem:[%s2428_s17 + $0x20] sm:$0xff] %v1413_v23  ;;  %v1414_v27 = vmax.f32 %v1398_v25, 0.0 }
 0x4ee   : > { %1422 = vst [vmem:[%s2428_s17 + $0x28] sm:$0xff] %v1414_v27 }
 0x4ef   : > { %v1402_v28 = vpop.f32.mrb[12].mxu0 }
 0x4f0   : > { %v1403_v29 = vadd.f32 %v1527_v46, %v1402_v28  ;;  %v1404_v30 = vpop.f32.mrb[13].mxu0 }
 0x4f1   : > { %v1405_v33 = vpop.f32.mrb[14].mxu0 }
 0x4f2   : > { %v1415_v34 = vmax.f32 %v1403_v29, 0.0  ;;  %v1406_v35 = vadd.f32 %v1527_v46, %v1405_v33  ;;  %v1407_v36 = vpop.f32.mrb[15].mxu0 }
 0x4f4   : > { %1423 = vst [vmem:[%s2428_s17 + $0x30] sm:$0xff] %v1415_v34  ;;  %v1416_v37 = vmax.f32 %v1406_v35, 0.0 }
 0x4f6   : > { %1424 = vst [vmem:[%s2428_s17 + $0x38] sm:$0xff] %v1416_v37 }
 0x4f7   : > { %1847 = shalt.err (!%p1844_p3)
}
 0x4f8   : > { %s1848_s13 = scalar_lea.hbm %s2441_s22, 1024  ;;  %s1852_s16 = scalar_lea.hbm %s2497_s7, 2048 }
 0x4f9   : > { %p1849_p4 = scmp.ne.s32.totalorder %s2441_s22, %s1848_s13  ;;  %p1853_p9 = scmp.lt.u32.totalorder %s2441_s22, %s2497_s7 }
 0x4fa   : > { %p1854_p10 = scmp.lt.u32.totalorder %s1852_s16, %s1848_s13  ;;  %p1856_p12 = scmp.lt.u32.totalorder %s1848_s13, %s2441_s22 }
 0x4fb   : > { %p1850_p7 = pnand %p1849_p4, %p1986_p5 }
 0x4fc   : > { %p1855_p11 = por %p1854_p10, %p1853_p9 }
 0x4fd   : > { %p1851_p8 = pneg %p1850_p7 }
 0x4fe   : > { %p1857_p13 = por %p1856_p12, %p1855_p11 }
 0x500   : > { %p1858_p0 = pnand %p1857_p13, %p1851_p8 }
 0x502   : > { %1861 = shalt.err (!%p1858_p0)
}
 0x503   : > { %s1906_s20 = smov 128   ;;  %s1907_s21 = smov 8  }
 0x504   : > { %1601 = dma.vmem_to_hbm [thread:$0]  (%p1986_p5), %s2443_s19, 1024, %s2441_s22, %s2449_s28, %s1906_s20, %s1906_s20, %s1907_s21  }
 0x505 PF: > { %p1607_p1 = scmp.ge.s32.totalorder %s1896_s27, 2  ;;  %s1455_s23 = sand.u32 1, %s1884_s24  }
 0x506   : > { %s1456_s29 = scalar_lea.sflag [#allocation3], %s1455_s23 }
 0x507   : > { %p1604_p2 = pnand %p1607_p1, %p1990_p6 }
 0x509   : > { %1879 = dma.done.wait (!%p1604_p2), %s1456_s29, 1024  }
 0x50a   : > { %1881 = vsyncadd (!%p1604_p2), %s1456_s29, 4294966272  ;;  %p17_p3 = scmp.ge.s32.totalorder %s1973_s30, 4   ;;  %s2500_s24 = smov %s1888_s25 }
 0x50b   : > { %s2501_s25 = smov %s1892_s26  ;;  %s2502_s26 = smov %s1984_s10 }
 0x50c   : > { %s2503_s27 = smov %s1973_s30  ;;  %19 = sbr.rel (!%p17_p3) target bundleno = 3 (0x3), region = 83 }
 0x513   :  { %1461 = vsyncpa [#allocation3], 1 }
 0x514   :  { %1463 = vsyncpa [#allocation3 + $0x1], 1 }

</bundles_post_ra>
